<compile_context>
chip_gen: v5e
topology: v5e:2x2
jax: 0.10.0
libtpu: 0.0.40
codegen_flags: <defaults>
</compile_context>

<pallas_src>
import functools

import jax
import jax.numpy as jnp
from jax.experimental import pallas as pl
from jax.experimental.pallas import tpu as pltpu


def _rmsnorm_kernel(x_ref, w_ref, o_ref, *, eps, inv_hidden):
    # Pass 1: sum of squares in f32.  variance = sum(x^2) * (1/hidden) ==
    # mean(x^2, -1, keepdim=True); the upcast here is streamed per-vreg.
    x_sq = x_ref[...].astype(jnp.float32)
    var = jnp.sum(x_sq * x_sq, axis=-1, keepdims=True) * inv_hidden
    inv = jax.lax.rsqrt(var + eps)
    # Pass 2: re-read/upcast the input (independent expression, so no full
    # (tile, hidden) f32 temporary needs to stay live across both passes),
    # normalize, apply the f32 weight, cast back to the input dtype.
    x = x_ref[...].astype(jnp.float32)
    o_ref[...] = (w_ref[...] * (x * inv)).astype(o_ref.dtype)


def _vmem_capacity_bytes():
    """Per-TensorCore VMEM capacity; falls back to 128 MiB if unqueryable."""
    try:
        info = pltpu.get_tpu_info()
        cap = getattr(info, "vmem_capacity_bytes", None)
        if cap:
            return int(cap)
    except Exception:
        pass
    return 128 * 1024 * 1024


def _choose_row_tile(rows, hidden, in_dtype, vmem_budget_bytes):
    """Pick a row tile: large enough to amortize per-step overhead, small
    enough for the VMEM budget, and giving >= 4 (preferably even) grid steps
    when the row count allows (keeps v7x's two TensorCores pipelined)."""
    itemsize = jnp.dtype(in_dtype).itemsize
    # Sublane packing minimum for the I/O dtype (bf16 -> 16, int8/fp8 -> 32).
    sub_min = {1: 32, 2: 16}.get(itemsize, 8)
    # Per-row VMEM bytes per grid step:
    #   input block  : 2 buffers * itemsize
    #   output block : 2 buffers * itemsize
    #   streamed f32 temporaries: ~4 B/elem (x_ref is re-read, not kept live)
    per_row = hidden * (4 * itemsize + 4)
    tile = max(sub_min, min(2048, vmem_budget_bytes // max(per_row, 1)))
    tile = max(sub_min, (tile // sub_min) * sub_min)
    # Never bigger than the (sublane-rounded) row count.
    rows_ceil = pl.cdiv(rows, sub_min) * sub_min
    tile = min(tile, rows_ceil)

    # Prefer >= 4 grid steps when rows allow: with only 2 steps each v7x core
    # gets a single step and its DMA double-buffering never overlaps.
    while tile > sub_min and pl.cdiv(rows, tile) < 4 and rows >= 4 * sub_min:
        new_tile = max(sub_min, ((tile // 2) // sub_min) * sub_min)
        if new_tile == tile:
            break
        tile = new_tile

    # Prefer an even step count so the two TensorCores stay balanced.
    n = pl.cdiv(rows, tile)
    if n > 1 and n % 2 == 1:
        cand = pl.cdiv(pl.cdiv(rows, n + 1), sub_min) * sub_min
        cand = max(sub_min, min(cand, tile))
        if pl.cdiv(rows, cand) % 2 == 0:
            tile = cand
    return tile


def nemotron_h_rmsnorm(hidden_states, weight, eps=1e-6, *, row_tile=None):
    """RMSNorm over the last axis. hidden_states: (..., hidden), weight: (hidden,)."""
    orig_shape = hidden_states.shape
    hidden = orig_shape[-1]
    in_dtype = hidden_states.dtype
    itemsize = jnp.dtype(in_dtype).itemsize

    x2d = hidden_states.reshape(-1, hidden)
    rows = x2d.shape[0]

    # Generation-aware VMEM sizing: ~62% of capacity as the tiling budget,
    # ~75% as the scoped limit (=> ~48 MiB on v7x's 64 MiB, ~96 MiB on the
    # 128 MiB v5e/v6e parts).
    cap = _vmem_capacity_bytes()
    vmem_budget = (cap * 5) // 8
    vmem_limit_cap = (cap * 3) // 4

    tile = row_tile if row_tile is not None else _choose_row_tile(
        rows, hidden, in_dtype, vmem_budget)
    grid = (pl.cdiv(rows, tile),)

    # Pre-cast weight to float32 once in the wrapper (reference multiplies by
    # weight.to(float32)); constant index_map keeps it resident across steps.
    w2d = weight.astype(jnp.float32).reshape(1, hidden)

    # VMEM limit: double-buffered in/out blocks + streamed f32 temporaries +
    # the resident weight, with 25% slack, clamped to the generation cap.
    per_step_bytes = tile * hidden * (4 * itemsize + 4) + 2 * hidden * 4
    vmem_limit = int(min(vmem_limit_cap,
                         max(32 * 1024 * 1024, int(per_step_bytes * 1.25))))

    cost = pl.CostEstimate(
        flops=4 * rows * hidden,
        transcendentals=rows,
        bytes_accessed=rows * hidden * 2 * itemsize + hidden * 4,
    )

    out = pl.pallas_call(
        functools.partial(_rmsnorm_kernel, eps=eps, inv_hidden=1.0 / hidden),
        out_shape=jax.ShapeDtypeStruct((rows, hidden), in_dtype),
        grid_spec=pltpu.PrefetchScalarGridSpec(
            num_scalar_prefetch=0,
            grid=grid,
            in_specs=[
                pl.BlockSpec((tile, hidden), lambda i: (i, 0)),
                pl.BlockSpec((1, hidden), lambda i: (0, 0)),  # weight resident
            ],
            out_specs=pl.BlockSpec((tile, hidden), lambda i: (i, 0)),
        ),
        compiler_params=pltpu.CompilerParams(
            dimension_semantics=("parallel",),
            vmem_limit_bytes=vmem_limit,
        ),
        cost_estimate=cost,
    )(x2d, w2d)

    return out.reshape(orig_shape)


def _reference_rmsnorm(hidden_states, weight, eps=1e-6):
    input_dtype = hidden_states.dtype
    x = hidden_states.astype(jnp.float32)
    var = jnp.mean(x * x, axis=-1, keepdims=True)
    x = x * jax.lax.rsqrt(var + eps)
    return (weight.astype(jnp.float32) * x).astype(input_dtype)


if __name__ == "__main__":
    eps = 1e-6
    key = jax.random.PRNGKey(0)
    k0, k1, k2 = jax.random.split(key, 3)

    # Primary small demo shape (batch=2, seq=8, hidden=32), bf16 input to
    # exercise the fp32 upcast + cast-back semantics.
    batch, seq, hidden = 2, 8, 32
    x = jax.random.normal(k0, (batch, seq, hidden), dtype=jnp.float32).astype(jnp.bfloat16)
    weight = jnp.ones((hidden,), dtype=jnp.float32)  # nn.Parameter(torch.ones(hidden))

    out = nemotron_h_rmsnorm(x, weight, eps=eps)
    out = jax.block_until_ready(out)
    ref = _reference_rmsnorm(x, weight, eps=eps)
    assert out.dtype == x.dtype
    assert out.shape == x.shape
    assert jnp.allclose(out.astype(jnp.float32), ref.astype(jnp.float32), atol=1e-2, rtol=1e-2)

    # Ragged row count (rows not a multiple of the sublane minimum) — exercises
    # the partial last row block with no wrapper padding / slicing.
    x2 = jax.random.normal(k1, (1, 5, hidden), dtype=jnp.float32)
    out2 = jax.block_until_ready(nemotron_h_rmsnorm(x2, weight, eps=eps))
    ref2 = _reference_rmsnorm(x2, weight, eps=eps)
    assert out2.shape == x2.shape
    assert jnp.allclose(out2, ref2, atol=1e-5, rtol=1e-5)

    # Multi-step grid with a partial last row block (rows=21, forced tile=16).
    x3 = jax.random.normal(k2, (3, 7, hidden), dtype=jnp.float32).astype(jnp.bfloat16)
    out3 = jax.block_until_ready(nemotron_h_rmsnorm(x3, weight, eps=eps, row_tile=16))
    ref3 = _reference_rmsnorm(x3, weight, eps=eps)
    assert out3.shape == x3.shape
    assert jnp.allclose(out3.astype(jnp.float32), ref3.astype(jnp.float32), atol=1e-2, rtol=1e-2)

    print("KERNEL_OK")
</pallas_src>

<mosaic_0001>
module attributes {stable_mosaic.version = 11 : i64} {
  func.func @_rmsnorm_kernel(%arg0: i32, %arg1: memref<16x32xbf16, #tpu.memory_space<vmem>>, %arg2: memref<1x32xf32, #tpu.memory_space<vmem>>, %arg3: memref<16x32xbf16, #tpu.memory_space<vmem>>) attributes {dimension_semantics = [#tpu.dimension_semantics<parallel>], iteration_bounds = array<i64: 1>, scalar_prefetch = 0 : i64, scratch_operands = 0 : i64, tpu.core_type = #tpu.core_type<tc>, window_params = [{transform_indices = @transform_0, window_bounds = array<i64: 16, 32>}, {pipeline_mode = #tpu.pipeline_mode<synchronous>, transform_indices = @transform_1, window_bounds = array<i64: 1, 32>}, {transform_indices = @transform_2, window_bounds = array<i64: 16, 32>}]} {
    %c0 = arith.constant 0 : index
    %c0_0 = arith.constant 0 : index
    %0 = vector.load %arg1[%c0, %c0_0] : memref<16x32xbf16, #tpu.memory_space<vmem>>, vector<16x32xbf16>
    %1 = arith.extf %0 : vector<16x32xbf16> to vector<16x32xf32>
    %2 = arith.mulf %1, %1 : vector<16x32xf32>
    %cst = arith.constant dense<0.000000e+00> : vector<16xf32>
    %3 = vector.multi_reduction <add>, %2, %cst [1] : vector<16x32xf32> to vector<16xf32>
    %4 = vector.shape_cast %3 : vector<16xf32> to vector<16x1xf32>
    %cst_1 = arith.constant 3.125000e-02 : f32
    %5 = vector.broadcast %cst_1 : f32 to vector<16x1xf32>
    %6 = arith.mulf %4, %5 : vector<16x1xf32>
    %cst_2 = arith.constant 9.99999997E-7 : f32
    %7 = vector.broadcast %cst_2 : f32 to vector<16x1xf32>
    %8 = arith.addf %6, %7 : vector<16x1xf32>
    %9 = math.rsqrt %8 : vector<16x1xf32>
    %c0_3 = arith.constant 0 : index
    %c0_4 = arith.constant 0 : index
    %10 = vector.load %arg1[%c0_3, %c0_4] : memref<16x32xbf16, #tpu.memory_space<vmem>>, vector<16x32xbf16>
    %11 = arith.extf %10 : vector<16x32xbf16> to vector<16x32xf32>
    %c0_5 = arith.constant 0 : index
    %c0_6 = arith.constant 0 : index
    %12 = vector.load %arg2[%c0_5, %c0_6] : memref<1x32xf32, #tpu.memory_space<vmem>>, vector<1x32xf32>
    %13 = vector.broadcast %9 : vector<16x1xf32> to vector<16x32xf32>
    %14 = arith.mulf %11, %13 : vector<16x32xf32>
    %15 = vector.broadcast %12 : vector<1x32xf32> to vector<16x32xf32>
    %16 = arith.mulf %15, %14 : vector<16x32xf32>
    %17 = arith.truncf %16 : vector<16x32xf32> to vector<16x32xbf16>
    %c0_7 = arith.constant 0 : index
    %c0_8 = arith.constant 0 : index
    %18 = vector.load %arg3[%c0_7, %c0_8] : memref<16x32xbf16, #tpu.memory_space<vmem>>, vector<16x32xbf16>
    tpu.vector_store %arg3[%c0_7, %c0_8], %17 {strides = array<i32>} : memref<16x32xbf16, #tpu.memory_space<vmem>>, vector<16x32xbf16>,
    return
  }
  func.func @transform_0(%arg0: i32) -> (i32, i32) {
    %c0_i32 = arith.constant 0 : i32
    %c0_i32_0 = arith.constant 0 : i32
    return %arg0, %c0_i32 : i32, i32
  }
  func.func @transform_1(%arg0: i32) -> (i32, i32) {
    %c0_i32 = arith.constant 0 : i32
    %c0_i32_0 = arith.constant 0 : i32
    %c0_i32_1 = arith.constant 0 : i32
    return %c0_i32, %c0_i32_0 : i32, i32
  }
  func.func @transform_2(%arg0: i32) -> (i32, i32) {
    %c0_i32 = arith.constant 0 : i32
    %c0_i32_0 = arith.constant 0 : i32
    return %arg0, %c0_i32 : i32, i32
  }
}

</mosaic_0001>

<bundles_post_ra>
// kernel: tpu_custom_call.1
= control target key start
LH: loop header
LB: loop body
LE: loop exit
PB: predicated region body
PF: predicated region fallthrough
CT: control target
= control target key end

     0   :  { %7 = vsyncpa [#allocation3], 0  ;;  %s239_s0 = inlined_call_operand.hbm [shape: bf16[16,32], index: 0, kind: input, shape index: {}]   ;;  %s240_s1 = inlined_call_operand.hbm [shape: f32[1,32], index: 1, kind: input, shape index: {}]   ;;  %s241_s2 = inlined_call_operand.hbm [shape: bf16[16,32], index: 2, kind: output, shape index: {}]  }
   0x1   :  { %8 = vsyncpa [#allocation6], 0 }
   0x2   :  { %9 = vsyncpa [#allocation4], 0  ;;  %s14_s11 = sshll.u32 %s239_s0, 4  ;;  %s204_s12 = smov [#allocation2]   ;;  %s15_s11 = int_to_ptr.hbm [resolvable:$true] %s14_s11 }
   0x3   :  { %s16_s13 = sshll.u32 %s204_s12, 4  ;;  %s28_s16 = sshll.u32 %s240_s1, 4  ;;  %s17_s13 = int_to_ptr.vmem [resolvable:$true] %s16_s13  ;;  %s29_s16 = int_to_ptr.hbm [resolvable:$true] %s28_s16 }
   0x4   :  { %s205_s17 = smov 64   ;;  %s206_s18 = smov 4  }
   0x5   :  { %22 = dma.hbm_to_vmem [thread:$0]  %s15_s11, 128, %s17_s13, [#allocation3], %s205_s17, %s205_s17, %s206_s18  }
   0x6   :  { %s207_s19 = smov [#allocation5]  }
   0x7   :  { %s30_s20 = sshll.u32 %s207_s19, 4  ;;  %s31_s20 = int_to_ptr.vmem [resolvable:$true] %s30_s20 }
   0x8   :  { %33 = dma.hbm_to_vmem [thread:$0]  %s29_s16, 16, %s31_s20, [#allocation6]  }
   0x9   :  { %198 = dma.done.wait [#allocation3], 128  }
   0xa   :  { %199 = vsyncadd [#allocation3], 4294967168 }
   0xb   :  { %200 = dma.done.wait [#allocation6], 16  }
   0xc   :  { %201 = vsyncadd [#allocation6], 4294967280  ;;  %v113_v0 = vld [vmem:[#allocation2] sm:$0xff]   ;;  %vm48_vm0 = vcmask 261120   ;;  %v121_v21 = vld [vmem:[#allocation5] ss:$0 sm:$0xff] }
   0xd   :  { %v114_v1 = vunpack.c.l.bf16 %v113_v0  ;;  %v115_v3 = vunpack.c.h.bf16 %v113_v0  ;;  %vm89_vm5 = vcmask 257024   ;;  %s208_s0 = smov [#allocation7]   ;;  %s98_s23 = sshll.u32 %s241_s2, 4  ;;  %s99_s23 = int_to_ptr.hbm [resolvable:$true] %s98_s23 }
   0xe   :  { %s96_s1 = sshll.u32 %s208_s0, 4  ;;  %s97_s1 = int_to_ptr.vmem [resolvable:$true] %s96_s1 }
   0xf   :  { %v46_v2 = vmul.f32 %v114_v1, %v114_v1  ;;  %v47_v5 = vmul.f32 %v115_v3, %v115_v3 }
  0x11   :  { %v49_v4 = vsel %vm48_vm0, %v46_v2, 0.0  ;;  %v52_v6 = vsel %vm48_vm0, %v47_v5, 0.0 }
  0x12   :  { %50 = vadd.xlane.f32.xlu0 %v49_v4 }
  0x1a   :  { %53 = vadd.xlane.f32.xlu0 %v52_v6 }
  0x85   :  { %v51_v7 = vpop.xlane.xlu0 %50 }
  0x86   :  { %v55_v8 = vmul.f32 0.03125, %v51_v7 }
  0x88   :  { %v57_v9 = vadd.f32 1e-06, %v55_v8 }
  0x8a   :  { %122 = vrsqrt.f32 %v57_v9  ;;  %vm65_vm2 = vweird.f32 %v57_v9 }
  0x8d   :  { %v54_v10 = vpop.xlane.xlu0 %53 }
  0x8e   :  { %v56_v11 = vmul.f32 0.03125, %v54_v10 }
  0x90   :  { %v123_v12 = vpop.eup %122  ;;  %v58_v13 = vadd.f32 1e-06, %v56_v11 }
  0x91   :  { %v60_v14 = vmul.f32 %v123_v12, %v57_v9  ;;  %vm66_vm1 = vweird.f32 %v123_v12 }
  0x92   :  { %124 = vrsqrt.f32 %v58_v13  ;;  %vm67_vm3 = vmor %vm65_vm2, %vm66_vm1  ;;  %vm75_vm6 = vweird.f32 %v58_v13 }
  0x93   :  { %v61_v15 = vmul.f32 %v123_v12, %v60_v14 }
  0x95   :  { %v62_v16 = vmul.f32 0.5, %v61_v15 }
  0x97   :  { %v63_v17 = vsub.f32 1.5, %v62_v16 }
  0x98   :  { %v125_v18 = vpop.eup %124 }
  0x99   :  { %v64_v19 = vmul.f32 %v123_v12, %v63_v17  ;;  %v70_v20 = vmul.f32 %v125_v18, %v58_v13  ;;  %vm76_vm4 = vweird.f32 %v125_v18 }
  0x9a   :  { %vm77_vm7 = vmor %vm75_vm6, %vm76_vm4 }
  0x9b   :  { %v68_v22 = vsel %vm67_vm3, %v123_v12, %v64_v19  ;;  %v71_v23 = vmul.f32 %v125_v18, %v70_v20 }
  0x9c   :  { %v80_v24 = vmul.f32 %v114_v1, %v68_v22 }
  0x9d   :  { %v72_v25 = vmul.f32 0.5, %v71_v23 }
  0x9e   :  { %v85_v26 = vmul.f32 %v121_v21, %v80_v24 }
  0x9f   :  { %v73_v27 = vsub.f32 1.5, %v72_v25 }
  0xa0   :  { %v87_v28 = vpack.c.bf16 %v85_v26, %v85_v26 }
  0xa1   :  { %v74_v29 = vmul.f32 %v125_v18, %v73_v27 }
  0xa2   :  { %90 = vst.msk [vmem:[#allocation7] sm:$0xf] %vm89_vm5, %v87_v28 }
  0xa3   :  { %v78_v30 = vsel %vm77_vm7, %v125_v18, %v74_v29 }
  0xa4   :  { %v81_v31 = vmul.f32 %v115_v3, %v78_v30 }
  0xa6   :  { %v86_v32 = vmul.f32 %v121_v21, %v81_v31 }
  0xa8   :  { %v88_v33 = vpack.c.bf16 %v86_v32, %v86_v32 }
  0xaa   :  { %91 = vst.msk [vmem:[#allocation7 + $0x4] sm:$0xf] %vm89_vm5, %v88_v33 }
  0xab   :  { %104 = dma.vmem_to_hbm [thread:$0]  %s97_s1, 128, %s99_s23, [#allocation4], %s205_s17, %s205_s17, %s206_s18  }
  0xac   :  { %202 = dma.done.wait [#allocation4], 128  }
  0xad   :  { %203 = vsyncadd [#allocation4], 4294967168 }
  0xae   :  { %109 = vsyncpa [#allocation3], 1 }
  0xaf   :  { %110 = vsyncpa [#allocation6], 1 }
  0xb0   :  { %111 = vsyncpa [#allocation4], 1 }

</bundles_post_ra>
